<compile_context>
chip_gen: v7x
topology: tpu7x:2x2x1
jax: 0.10.0
libtpu: 0.0.40
codegen_flags: <defaults>
</compile_context>

<pallas_src>
import jax
import jax.numpy as jnp
from jax.experimental import pallas as pl
from jax.experimental.pallas import tpu as pltpu


def _choose_packing(n, d):
    """Samples packed per lane-row.  Must divide N so the repack is a free
    row-major reshape (no HBM copy).  256-lane rows match the v6e/v7x MXU."""
    if d <= 128 and 128 % d == 0:
        for lanes in (256, 128):
            p = lanes // d
            if p >= 1 and n % p == 0:
                return p
    return 1  # unpacked fallback: still zero copies, just lane-padded in VMEM


def _choose_tile_rows(rows, lanes):
    """Packed rows per grid step: ~8 MiB of X, within a 40 MiB VMEM budget that
    includes double-buffered X blocks AND the lane-padded output blocks."""
    row_hbm = lanes * 4
    row_vmem = 2 * max(lanes, 128) * 4 + 2 * 128 * 4   # 2x X buf + 2x out buf
    max_rows = min((8 * 1024 * 1024) // row_hbm,
                   (40 * 1024 * 1024) // row_vmem)
    max_rows = max(8, (max_rows // 8) * 8)
    if rows <= min(2048, max_rows):
        return rows                                     # tiny: single full block
    steps = max(2, pl.cdiv(rows, max_rows))
    if steps % 2:                                       # balance v7x's 2 TensorCores
        steps += 1
    return max(8, ((pl.cdiv(rows, steps) + 7) // 8) * 8)


def _linreg_kernel(xp_ref, wrow_ref, seg_ref, b_ref, o_ref):
    # xp_ref  : (tile, W)  lane-dense packed X rows (P samples per row)
    # wrow_ref: (1, W)     weights tiled P times along lanes (resident)
    # seg_ref : (W, P)     0/1 block-diagonal segment-sum matrix (resident)
    # b_ref   : (1, 1)     bias scalar in SMEM
    # o_ref   : (tile, P)  P predictions per packed row
    t = xp_ref[...] * wrow_ref[...]                      # exact f32 products (VPU)
    t_hi = t.astype(jnp.bfloat16).astype(jnp.float32)    # bf16-exact high part
    t_lo = t - t_hi                                      # bf16-exact low part
    acc = jnp.dot(t_hi, seg_ref[...], preferred_element_type=jnp.float32)
    acc = acc + jnp.dot(t_lo, seg_ref[...], preferred_element_type=jnp.float32)
    o_ref[...] = (acc + b_ref[0, 0]).astype(o_ref.dtype)


def linear_regression_forward(x, w, b):
    """Forward of torch.nn.Linear(D, 1):  x (N, D) f32 -> (N, 1) f32."""
    x = jnp.asarray(x, jnp.float32)
    n, d = x.shape
    w = jnp.asarray(w, jnp.float32).reshape(d)
    b = jnp.asarray(b, jnp.float32).reshape(1, 1)

    p = _choose_packing(n, d)
    lanes = p * d
    rows = n // p                                        # exact: p divides n
    xp = x.reshape(rows, lanes)                          # free row-major repack

    # wrow[0, j*d + k] = w[k];  seg[j*d + k, j2] = (j == j2)
    wrow = jnp.tile(w, p).reshape(1, lanes)
    seg = (jnp.eye(p, dtype=jnp.float32)[:, None, :]
           * jnp.ones((1, d, 1), jnp.float32)).reshape(lanes, p)

    tile = _choose_tile_rows(rows, lanes)
    grid = (pl.cdiv(rows, tile),)

    out = pl.pallas_call(
        _linreg_kernel,
        out_shape=jax.ShapeDtypeStruct((rows, p), jnp.float32),
        grid_spec=pltpu.PrefetchScalarGridSpec(
            num_scalar_prefetch=0,
            grid=grid,
            in_specs=[
                pl.BlockSpec((tile, lanes), lambda i: (i, 0)),        # packed X tile
                pl.BlockSpec((1, lanes), lambda i: (0, 0)),           # resident weights
                pl.BlockSpec((lanes, p), lambda i: (0, 0)),           # resident seg-sum
                pl.BlockSpec(memory_space=pltpu.MemorySpace.SMEM),    # scalar bias
            ],
            out_specs=pl.BlockSpec((tile, p), lambda i: (i, 0)),
        ),
        compiler_params=pltpu.CompilerParams(
            dimension_semantics=("parallel",),
            vmem_limit_bytes=48 * 1024 * 1024,
        ),
    )(xp, wrow, seg, b)

    # Free layout plumbing back to torch's (N, 1); rows * p == n exactly.
    return out.reshape(n, 1)


if __name__ == "__main__":
    key = jax.random.PRNGKey(0)
    kx, kw, kb, kx2, kx3 = jax.random.split(key, 5)

    # Small shapes consistent with the module: N samples, D = input_dim.
    N, D = 128, 32
    bound = 1.0 / (D ** 0.5)                 # mimic torch.nn.Linear default init
    w = jax.random.uniform(kw, (1, D), jnp.float32, minval=-bound, maxval=bound)
    b = jax.random.uniform(kb, (1,), jnp.float32, minval=-bound, maxval=bound)
    x = jax.random.normal(kx, (N, D), jnp.float32)

    out = jax.block_until_ready(linear_regression_forward(x, w, b))
    ref = x @ w.reshape(D, 1) + b
    assert out.shape == (N, 1)
    assert jnp.allclose(out, ref, atol=1e-4, rtol=1e-4), "mismatch vs reference"

    # Non-tile-aligned batch: packed path (1000 % 8 == 0), cdiv grid, no pad copy.
    N2 = 1000
    x2 = jax.random.normal(kx2, (N2, D), jnp.float32)
    out2 = jax.block_until_ready(linear_regression_forward(x2, w, b))
    ref2 = x2 @ w.reshape(D, 1) + b
    assert out2.shape == (N2, 1)
    assert jnp.allclose(out2, ref2, atol=1e-4, rtol=1e-4), "mismatch (ragged)"

    # Odd batch: exercises the unpacked fallback (still zero padding copies).
    N3 = 37
    x3 = jax.random.normal(kx3, (N3, D), jnp.float32)
    out3 = jax.block_until_ready(linear_regression_forward(x3, w, b))
    ref3 = x3 @ w.reshape(D, 1) + b
    assert out3.shape == (N3, 1)
    assert jnp.allclose(out3, ref3, atol=1e-4, rtol=1e-4), "mismatch (odd batch)"

    print("KERNEL_OK")
</pallas_src>

<mosaic_0001>
module attributes {stable_mosaic.version = 11 : i64} {
  func.func @_linreg_kernel(%arg0: i32, %arg1: memref<16x256xf32, #tpu.memory_space<vmem>>, %arg2: memref<1x256xf32, #tpu.memory_space<vmem>>, %arg3: memref<256x8xf32, #tpu.memory_space<vmem>>, %arg4: memref<1x1xf32, #tpu.memory_space<smem>>, %arg5: memref<16x8xf32, #tpu.memory_space<vmem>>) attributes {dimension_semantics = [#tpu.dimension_semantics<parallel>], iteration_bounds = array<i64: 1>, scalar_prefetch = 0 : i64, scratch_operands = 0 : i64, tpu.core_type = #tpu.core_type<tc>, window_params = [{transform_indices = @transform_0, window_bounds = array<i64: 16, 256>}, {pipeline_mode = #tpu.pipeline_mode<synchronous>, transform_indices = @transform_1, window_bounds = array<i64: 1, 256>}, {pipeline_mode = #tpu.pipeline_mode<synchronous>, transform_indices = @transform_2, window_bounds = array<i64: 256, 8>}, {transform_indices = @transform_3, window_bounds = array<i64: 1, 1>}, {transform_indices = @transform_4, window_bounds = array<i64: 16, 8>}]} {
    %c0 = arith.constant 0 : index
    %c0_0 = arith.constant 0 : index
    %0 = vector.load %arg1[%c0, %c0_0] : memref<16x256xf32, #tpu.memory_space<vmem>>, vector<16x256xf32>
    %c0_1 = arith.constant 0 : index
    %c0_2 = arith.constant 0 : index
    %1 = vector.load %arg2[%c0_1, %c0_2] : memref<1x256xf32, #tpu.memory_space<vmem>>, vector<1x256xf32>
    %2 = vector.broadcast %1 : vector<1x256xf32> to vector<16x256xf32>
    %3 = arith.mulf %0, %2 : vector<16x256xf32>
    %4 = arith.truncf %3 : vector<16x256xf32> to vector<16x256xbf16>
    %5 = arith.extf %4 : vector<16x256xbf16> to vector<16x256xf32>
    %6 = arith.subf %3, %5 : vector<16x256xf32>
    %c0_3 = arith.constant 0 : index
    %c0_4 = arith.constant 0 : index
    %7 = vector.load %arg3[%c0_3, %c0_4] : memref<256x8xf32, #tpu.memory_space<vmem>>, vector<256x8xf32>
    %cst = arith.constant dense<0.000000e+00> : vector<16x8xf32>
    %8 = tpu.matmul %5, %7, %cst {dimension_numbers = #tpu.dot_dimension_numbers<[1], [0], [0], [1], [0, 0, 1, 1], [], []>} : vector<16x256xf32>, vector<256x8xf32>, vector<16x8xf32> -> vector<16x8xf32>
    %c0_5 = arith.constant 0 : index
    %c0_6 = arith.constant 0 : index
    %9 = vector.load %arg3[%c0_5, %c0_6] : memref<256x8xf32, #tpu.memory_space<vmem>>, vector<256x8xf32>
    %cst_7 = arith.constant dense<0.000000e+00> : vector<16x8xf32>
    %10 = tpu.matmul %6, %9, %cst_7 {dimension_numbers = #tpu.dot_dimension_numbers<[1], [0], [0], [1], [0, 0, 1, 1], [], []>} : vector<16x256xf32>, vector<256x8xf32>, vector<16x8xf32> -> vector<16x8xf32>
    %11 = arith.addf %8, %10 : vector<16x8xf32>
    %c0_8 = arith.constant 0 : index
    %c0_9 = arith.constant 0 : index
    %12 = memref.load %arg4[%c0_8, %c0_9] : memref<1x1xf32, #tpu.memory_space<smem>>
    %13 = vector.broadcast %12 : f32 to vector<16x8xf32>
    %14 = arith.addf %11, %13 : vector<16x8xf32>
    %c0_10 = arith.constant 0 : index
    %c0_11 = arith.constant 0 : index
    %15 = vector.load %arg5[%c0_10, %c0_11] : memref<16x8xf32, #tpu.memory_space<vmem>>, vector<16x8xf32>
    tpu.vector_store %arg5[%c0_10, %c0_11], %14 {strides = array<i32>} : memref<16x8xf32, #tpu.memory_space<vmem>>, vector<16x8xf32>,
    return
  }
  func.func @transform_0(%arg0: i32) -> (i32, i32) {
    %c0_i32 = arith.constant 0 : i32
    %c0_i32_0 = arith.constant 0 : i32
    return %arg0, %c0_i32 : i32, i32
  }
  func.func @transform_1(%arg0: i32) -> (i32, i32) {
    %c0_i32 = arith.constant 0 : i32
    %c0_i32_0 = arith.constant 0 : i32
    %c0_i32_1 = arith.constant 0 : i32
    return %c0_i32, %c0_i32_0 : i32, i32
  }
  func.func @transform_2(%arg0: i32) -> (i32, i32) {
    %c0_i32 = arith.constant 0 : i32
    %c0_i32_0 = arith.constant 0 : i32
    %c0_i32_1 = arith.constant 0 : i32
    return %c0_i32, %c0_i32_0 : i32, i32
  }
  func.func @transform_3(%arg0: i32) -> (i32, i32) {
    %c0_i32 = arith.constant 0 : i32
    %c0_i32_0 = arith.constant 0 : i32
    %c0_i32_1 = arith.constant 0 : i32
    return %c0_i32, %c0_i32_0 : i32, i32
  }
  func.func @transform_4(%arg0: i32) -> (i32, i32) {
    %c0_i32 = arith.constant 0 : i32
    %c0_i32_0 = arith.constant 0 : i32
    return %arg0, %c0_i32 : i32, i32
  }
}

</mosaic_0001>

<bundles_post_ra>
// kernel: tpu_custom_call.1
= control target key start
LH: loop header
LB: loop body
LE: loop exit
PB: predicated region body
PF: predicated region fallthrough
CT: control target
= control target key end

     0   :  { %v24_v3 = vlaneseq  ;;  %vm234_vm0 = vcmask 64512   ;;  %s526_s2 = inlined_call_operand.vmem [shape: f32[256,8], index: 2, kind: input, shape index: {}]   ;;  %s527_s0 = inlined_call_operand.vmem [shape: f32[16,256], index: 0, kind: input, shape index: {}]   ;;  %s528_s1 = inlined_call_operand.vmem [shape: f32[1,256], index: 1, kind: input, shape index: {}]   ;;  %s529_s3 = inlined_call_operand.<no memory space> [shape: f32[1,1], index: 3, kind: input, shape index: {}]   ;;  %s530_s4 = inlined_call_operand.vmem [shape: f32[16,8], index: 4, kind: output, shape index: {}]  }
   0x1   :  { %v64_v0 = vld [vmem:[%s526_s2 + $0x80] sm:$0xff]  ;;  %v65_v1 = vld [vmem:[%s526_s2 + $0x88] sm:$0xff]  ;;  %v66_v6 = vld [vmem:[%s526_s2 + $0x90] sm:$0xff] }
   0x2   :  { %v48_v2 = vld [vmem:[%s526_s2] sm:$0xff]  ;;  %v317_v4 = vpack.c.bf16 %v65_v1, %v64_v0  ;;  %v49_v5 = vld [vmem:[%s526_s2 + $0x8] sm:$0xff]  ;;  %v67_v7 = vld [vmem:[%s526_s2 + $0x98] sm:$0xff]  ;;  %v25_v15 = vshrl.u32 %v24_v3, 7 }
   0x3   :  { %v319_v8 = vpack.c.bf16 %v49_v5, %v48_v2  ;;  %v321_v9 = vpack.c.bf16 %v67_v7, %v66_v6  ;;  %v50_v10 = vld [vmem:[%s526_s2 + $0x10] sm:$0xff]  ;;  %v51_v11 = vld [vmem:[%s526_s2 + $0x18] sm:$0xff]  ;;  %v68_v12 = vld [vmem:[%s526_s2 + $0xa0] sm:$0xff] }
   0x4   :  { %318 = vmatprep.subr.bf16.mxu0 %v317_v4  ;;  %350 = vmatprep.subr.bf16.mxu1 %v317_v4  ;;  %v69_v13 = vld [vmem:[%s526_s2 + $0xa8] sm:$0xff]  ;;  %v323_v14 = vpack.c.bf16 %v51_v11, %v50_v10  ;;  %v52_v17 = vld [vmem:[%s526_s2 + $0x20] sm:$0xff]  ;;  %v70_v19 = vld [vmem:[%s526_s2 + $0xb0] sm:$0xff]  ;;  %v30_v22 = vsub.s32 1, %v25_v15  ;;  %v26_v31 = vsub.s32 0, %v25_v15  ;;  %v231_v15 = vstv %s529_s3 }
   0x5   :  { %320 = vmatpush3.bf16.msra.mxu0 %v319_v8  ;;  %352 = vmatpush3.bf16.msra.mxu1 %v319_v8  ;;  %v325_v16 = vpack.c.bf16 %v69_v13, %v68_v12  ;;  %v53_v18 = vld [vmem:[%s526_s2 + $0x28] sm:$0xff]  ;;  %v71_v20 = vld [vmem:[%s526_s2 + $0xb8] sm:$0xff]  ;;  %v54_v24 = vld [vmem:[%s526_s2 + $0x30] sm:$0xff] }
   0x6   :  { %322 = vmatprep.subr.bf16.mxu0 %v321_v9  ;;  %354 = vmatprep.subr.bf16.mxu1 %v321_v9  ;;  %v327_v21 = vpack.c.bf16 %v53_v18, %v52_v17  ;;  %v329_v23 = vpack.c.bf16 %v71_v20, %v70_v19  ;;  %v55_v25 = vld [vmem:[%s526_s2 + $0x38] sm:$0xff]  ;;  %v72_v26 = vld [vmem:[%s526_s2 + $0xc0] sm:$0xff]  ;;  %v73_v27 = vld [vmem:[%s526_s2 + $0xc8] sm:$0xff] }
   0x7   :  { %v19_v28 = vld [vmem:[%s527_s0 + $0x8] sm:$0xff]  ;;  %v21_v29 = vld [vmem:[%s527_s0 + $0x18] sm:$0xff]  ;;  %v22_v30 = vld [vmem:[%s528_s1] sm:$0x3]  ;;  %v331_v32 = vpack.c.bf16 %v55_v25, %v54_v24  ;;  %v333_v34 = vpack.c.bf16 %v73_v27, %v72_v26 }
   0x8   :  { %v31_v33 = vrot.slane %v22_v30, %v30_v22  ;;  %v56_v35 = vld [vmem:[%s526_s2 + $0x40] sm:$0xff]  ;;  %v57_v36 = vld [vmem:[%s526_s2 + $0x48] sm:$0xff]  ;;  %v74_v37 = vld [vmem:[%s526_s2 + $0xd0] sm:$0xff]  ;;  %v27_v41 = vrot.slane %v22_v30, %v26_v31 }
   0x9   :  { %324 = vmatpush3.bf16.msra.mxu0 %v323_v14  ;;  %356 = vmatpush3.bf16.msra.mxu1 %v323_v14  ;;  %v75_v38 = vld [vmem:[%s526_s2 + $0xd8] sm:$0xff]  ;;  %v335_v42 = vpack.c.bf16 %v57_v36, %v56_v35  ;;  %v20_v43 = vld [vmem:[%s527_s0 + $0x10] sm:$0xff]  ;;  %v18_v45 = vld [vmem:[%s527_s0] sm:$0xff] }
   0xa   :  { %326 = vmatprep.subr.bf16.mxu0 %v325_v16  ;;  %358 = vmatprep.subr.bf16.mxu1 %v325_v16  ;;  %v35_v39 = vmul.f32 %v31_v33, %v19_v28  ;;  %v37_v40 = vmul.f32 %v31_v33, %v21_v29  ;;  %v337_v46 = vpack.c.bf16 %v75_v38, %v74_v37  ;;  %v58_v47 = vld [vmem:[%s526_s2 + $0x50] sm:$0xff]  ;;  %v59_v48 = vld [vmem:[%s526_s2 + $0x58] sm:$0xff]  ;;  %v76_v49 = vld [vmem:[%s526_s2 + $0xe0] sm:$0xff] }
   0xb   :  { %v77_v50 = vld [vmem:[%s526_s2 + $0xe8] sm:$0xff]  ;;  %v36_v52 = vmul.f32 %v27_v41, %v20_v43  ;;  %v34_v53 = vmul.f32 %v27_v41, %v18_v45  ;;  %v339_v54 = vpack.c.bf16 %v59_v48, %v58_v47  ;;  %v60_v57 = vld [vmem:[%s526_s2 + $0x60] sm:$0xff]  ;;  %v78_v59 = vld [vmem:[%s526_s2 + $0xf0] sm:$0xff] }
   0xc   :  { %v39_v44 = vpack.c.bf16 %v37_v40, %v35_v39  ;;  %v341_v56 = vpack.c.bf16 %v77_v50, %v76_v49  ;;  %v61_v58 = vld [vmem:[%s526_s2 + $0x68] sm:$0xff]  ;;  %v79_v60 = vld [vmem:[%s526_s2 + $0xf8] sm:$0xff]  ;;  %v62_v0 = vld [vmem:[%s526_s2 + $0x70] sm:$0xff] }
   0xd   :  { %328 = vmatpush3.bf16.msra.mxu0 %v327_v21  ;;  %360 = vmatpush3.bf16.msra.mxu1 %v327_v21  ;;  %v38_v61 = vpack.c.bf16 %v36_v52, %v34_v53  ;;  %v343_v62 = vpack.c.bf16 %v61_v58, %v60_v57  ;;  %v345_v63 = vpack.c.bf16 %v79_v60, %v78_v59  ;;  %v63_v1 = vld [vmem:[%s526_s2 + $0x78] sm:$0xff] }
   0xe   :  { %330 = vmatprep.subr.bf16.mxu0 %v329_v23  ;;  %362 = vmatprep.subr.bf16.mxu1 %v329_v23  ;;  %v41_v51 = vunpack.c.l.bf16 %v39_v44  ;;  %v347_v3 = vpack.c.bf16 %v63_v1, %v62_v0  ;;  %v43_v4 = vunpack.c.h.bf16 %v39_v44 }
   0xf   :  { %v40_v2 = vunpack.c.l.bf16 %v38_v61  ;;  %v42_v6 = vunpack.c.h.bf16 %v38_v61 }
  0x10   :  { %v45_v55 = vsub.f32 %v35_v39, %v41_v51  ;;  %219 = vmatprep.mubr.f32.mxu1 %v41_v51  ;;  %v47_v7 = vsub.f32 %v37_v40, %v43_v4 }
  0x11   :  { %332 = vmatpush3.bf16.msra.mxu0 %v331_v32  ;;  %364 = vmatpush3.bf16.msra.mxu1 %v331_v32  ;;  %v44_v5 = vsub.f32 %v34_v53, %v40_v2  ;;  %v46_v8 = vsub.f32 %v36_v52, %v42_v6 }
  0x12   :  { %334 = vmatprep.subr.bf16.mxu0 %v333_v34  ;;  %366 = vmatprep.subr.bf16.mxu1 %v333_v34 }
  0x13   :  { %144 = vmatprep.mubr.f32.mxu0 %v45_v55 }
  0x15   :  { %336 = vmatpush3.bf16.msra.mxu0 %v335_v42  ;;  %368 = vmatpush3.bf16.msra.mxu1 %v335_v42 }
  0x16   :  { %338 = vmatprep.subr.bf16.mxu0 %v337_v46  ;;  %370 = vmatprep.subr.bf16.mxu1 %v337_v46 }
  0x19   :  { %340 = vmatpush3.bf16.msra.mxu0 %v339_v54  ;;  %372 = vmatpush3.bf16.msra.mxu1 %v339_v54 }
  0x1a   :  { %342 = vmatprep.subr.bf16.mxu0 %v341_v56  ;;  %374 = vmatprep.subr.bf16.mxu1 %v341_v56 }
  0x1d   :  { %344 = vmatpush3.bf16.msra.mxu0 %v343_v62  ;;  %376 = vmatpush3.bf16.msra.mxu1 %v343_v62 }
  0x1e   :  { %346 = vmatprep.subr.bf16.mxu0 %v345_v63  ;;  %378 = vmatprep.subr.bf16.mxu1 %v345_v63 }
  0x21   :  { %348 = vmatpush3.bf16.msra.mxu0 %v347_v3  ;;  %380 = vmatpush3.bf16.msra.mxu1 %v347_v3 }
  0x24   :  { %145 = vmatmul.mubr.f32.vlgmr.msra.gmra.mrb[0].mxu0 %v44_v5  ;;  %220 = vmatmul.mubr.f32.vlgmr.msra.gmra.mrb[0].mxu1 %v40_v2 }
  0x25   :  { %149 = vmatprep.mubr.f32.mxu0 %v47_v7  ;;  %224 = vmatprep.mubr.f32.mxu1 %v43_v4 }
  0x28   :  { %150 = vmatmul.mubr.f32.gmra.mrb[2].mxu0 %v46_v8  ;;  %225 = vmatmul.mubr.f32.gmra.mrb[2].mxu1 %v42_v6 }
  0xf7   :  { %v273_v9 = vpop.f32.mrb[0].mxu0  ;;  %v311_v10 = vpop.f32.mrb[0].mxu1 }
  0xf8   :  { %v274_v11 = vpop.f32.mrb[1].mxu0  ;;  %v312_v12 = vpop.f32.mrb[1].mxu1 }
  0xf9   :  { %v275_v13 = vadd.f32 %v274_v11, %v273_v9  ;;  %v313_v14 = vadd.f32 %v312_v12, %v311_v10 }
  0xfb   :  { %v222_v16 = vadd.f32 %v313_v14, %v275_v13  ;;  %v276_v17 = vpop.f32.mrb[2].mxu0  ;;  %v314_v18 = vpop.f32.mrb[2].mxu1 }
  0xfc   :  { %v277_v19 = vpop.f32.mrb[3].mxu0  ;;  %v315_v20 = vpop.f32.mrb[3].mxu1 }
  0xfd   :  { %v232_v21 = vadd.f32 %v231_v15, %v222_v16  ;;  %v278_v22 = vadd.f32 %v277_v19, %v276_v17  ;;  %v316_v23 = vadd.f32 %v315_v20, %v314_v18 }
  0xff   :  { %235 = vst.msk [vmem:[%s530_s4] sm:$0xff] %vm234_vm0, %v232_v21  ;;  %v227_v24 = vadd.f32 %v316_v23, %v278_v22 }
 0x101   :  { %v233_v25 = vadd.f32 %v231_v15, %v227_v24 }
 0x103   :  { %236 = vst.msk [vmem:[%s530_s4 + $0x8] sm:$0xff] %vm234_vm0, %v233_v25 }

</bundles_post_ra>
